<compile_context>
chip_gen: v6e
topology: v6e:2x2x1
jax: 0.10.0
libtpu: 0.0.40
codegen_flags: <defaults>
</compile_context>

<pallas_src>
import functools

import jax
import jax.numpy as jnp
from jax.experimental import pallas as pl
from jax.experimental.pallas import tpu as pltpu

LANE = 128          # vreg lane width (last dim)
NEG_MASK = -1e30    # finite in f32; poisons pad-class logits


def _round_up(x, m):
    return (x + m - 1) // m * m


def gcn_kernel(a_ref, x_ref, w1_ref, b1_ref, w2_ref, b2_ref, w3_ref, b3_ref,
               o_ref):
    """Fused 3-layer GCN forward on lane-padded, VMEM-resident operands.

    a_ref : (Np, Np)      row-normalized adjacency, MXU dtype (bf16 or f32)
    x_ref : (Np, Fp)      node features, MXU dtype
    w*_ref: (in_p, out_p) weights, pre-transposed + zero-padded, MXU dtype
    b*_ref: (1, out_p)    biases, f32; b3 pad lanes hold NEG_MASK
    o_ref : (Np, Cp)      log-probabilities, f32 (pad classes ~ NEG_MASK)
    """
    f32 = jnp.float32
    a = a_ref[...]
    cdt = a.dtype                        # MXU operand dtype

    # ---- layer 1: relu(A @ (x @ W1 + b1)) ----
    h = jnp.dot(x_ref[...], w1_ref[...], preferred_element_type=f32)
    h = h + b1_ref[...]
    h = jnp.maximum(jnp.dot(a, h.astype(cdt), preferred_element_type=f32), 0.0)

    # ---- layer 2: relu(A @ (h @ W2 + b2)) ----
    h = jnp.dot(h.astype(cdt), w2_ref[...], preferred_element_type=f32)
    h = h + b2_ref[...]
    h = jnp.maximum(jnp.dot(a, h.astype(cdt), preferred_element_type=f32), 0.0)

    # ---- layer 3: log_softmax(h @ W3 + b3) ----
    # Pad-class columns of W3 are zero and pad lanes of b3 are NEG_MASK, so
    # pad logits are already ~-inf: no explicit iota/where mask needed.
    logits = jnp.dot(h.astype(cdt), w3_ref[...], preferred_element_type=f32)
    logits = logits + b3_ref[...]
    m = jnp.max(logits, axis=1, keepdims=True)
    z = logits - m
    lse = jnp.log(jnp.sum(jnp.exp(z), axis=1, keepdims=True))
    o_ref[...] = z - lse


def prepare_params(w1, b1, w2, b2, w3, b3, matmul_dtype=jnp.bfloat16):
    """One-time parameter prep: transpose nn.Linear weights to (in, out),
    zero-pad every feature dim to a multiple of 128 lanes, cast MXU operands
    to `matmul_dtype`.  Biases stay f32; fc3's pad lanes are pre-poisoned with
    NEG_MASK so the kernel needs no class mask."""
    def pad_weight(w):                      # (out, in) -> (in_pad, out_pad)
        out_d, in_d = w.shape
        wt = jnp.zeros((_round_up(in_d, LANE), _round_up(out_d, LANE)),
                       matmul_dtype)
        return wt.at[:in_d, :out_d].set(w.T.astype(matmul_dtype))

    def pad_bias(b, pad_value=0.0):         # (out,) -> (1, out_pad), f32
        (out_d,) = b.shape
        bb = jnp.full((1, _round_up(out_d, LANE)), pad_value, jnp.float32)
        return bb.at[0, :out_d].set(b.astype(jnp.float32))

    return (pad_weight(w1), pad_bias(b1),
            pad_weight(w2), pad_bias(b2),
            pad_weight(w3), pad_bias(b3, pad_value=NEG_MASK))


def prepare_graph(a, matmul_dtype=jnp.bfloat16):
    """One-time graph prep (hoisted out of the forward pass): zero-pad the
    dense row-normalized adjacency to a 128-multiple on BOTH dims (lane-dense
    and bf16 sublane-dense) and cast it to the MXU dtype."""
    n = a.shape[0]
    n_pad = _round_up(n, LANE)
    a_p = jnp.zeros((n_pad, n_pad), matmul_dtype)
    return a_p.at[:n, :n].set(a.astype(matmul_dtype))


def gcn_forward(a_p, x, params, *, num_classes):
    """Pallas GCN forward.  `a_p` from prepare_graph, `params` from
    prepare_params.  Only the (tiny) feature matrix is padded per call."""
    w1, b1, w2, b2, w3, b3 = params
    cdt = w1.dtype
    n, f_in = x.shape
    n_pad = a_p.shape[0]
    f_pad = w1.shape[0]
    h_pad = w2.shape[0]
    c_pad = w3.shape[1]

    # Pad (and cast) the per-call features.  Zero rows/cols are exact no-ops
    # for the aggregation and are sliced away at the end.
    x_p = jnp.zeros((n_pad, f_pad), cdt).at[:n, :f_in].set(x.astype(cdt))

    itemsize = jnp.dtype(cdt).itemsize
    flops = 2 * (n_pad * f_pad * h_pad + n_pad * n_pad * h_pad     # layer 1
                 + n_pad * h_pad * h_pad + n_pad * n_pad * h_pad   # layer 2
                 + n_pad * h_pad * c_pad)                          # layer 3
    bytes_accessed = ((a_p.size + x_p.size) * itemsize
                      + sum(p.size * p.dtype.itemsize for p in params)
                      + n_pad * c_pad * 4)
    cost = pl.CostEstimate(flops=flops,
                           transcendentals=n_pad * c_pad + n_pad,
                           bytes_accessed=bytes_accessed)

    vmem = pl.BlockSpec(memory_space=pltpu.MemorySpace.VMEM)
    out_pad = pl.pallas_call(
        gcn_kernel,
        out_shape=jax.ShapeDtypeStruct((n_pad, c_pad), jnp.float32),
        in_specs=[vmem] * 8,
        out_specs=vmem,
        cost_estimate=cost,
    )(a_p, x_p, w1, b1, w2, b2, w3, b3)
    return out_pad[:n, :num_classes]


def gcn_forward_ref(a_p, x, params, *, num_classes):
    """Pure-JAX mirror of gcn_forward (same padding / dtypes / ordering).
    Used as a tight numerical reference for the Pallas kernel."""
    w1, b1, w2, b2, w3, b3 = params
    cdt = w1.dtype
    n, f_in = x.shape
    n_pad = a_p.shape[0]
    x_p = jnp.zeros((n_pad, w1.shape[0]), cdt).at[:n, :f_in].set(x.astype(cdt))
    dot = functools.partial(jnp.dot, preferred_element_type=jnp.float32)

    h = dot(x_p, w1) + b1
    h = jnp.maximum(dot(a_p, h.astype(cdt)), 0.0)
    h = dot(h.astype(cdt), w2) + b2
    h = jnp.maximum(dot(a_p, h.astype(cdt)), 0.0)
    logits = dot(h.astype(cdt), w3) + b3
    z = logits - jnp.max(logits, axis=1, keepdims=True)
    out = z - jnp.log(jnp.sum(jnp.exp(z), axis=1, keepdims=True))
    return out[:n, :num_classes]


def reference_forward(a, x, w1, b1, w2, b2, w3, b3):
    """Original (PyTorch-module) formula in plain f32 JAX."""
    h = jnp.maximum(a @ (x @ w1.T + b1), 0.0)
    h = jnp.maximum(a @ (h @ w2.T + b2), 0.0)
    return jax.nn.log_softmax(h @ w3.T + b3, axis=1)


if __name__ == "__main__":
    # Karate-club-like sizes: 34 nodes, 16 input features, 30 hidden, 4 classes.
    N, F_IN, HIDDEN, NUM_CLASSES = 34, 16, 30, 4

    key = jax.random.PRNGKey(0)
    k_adj, k_x, k_w1, k_b1, k_w2, k_b2, k_w3, k_b3 = jax.random.split(key, 8)

    # Random symmetric 0/1 adjacency, then normalize: A = D^-1 (W + I)
    upper = (jax.random.uniform(k_adj, (N, N)) < 0.15).astype(jnp.float32)
    upper = jnp.triu(upper, k=1)
    w_adj = upper + upper.T
    h_adj = w_adj + jnp.eye(N, dtype=jnp.float32)
    deg = jnp.sum(h_adj, axis=1, keepdims=True)
    a = h_adj / deg                               # row-normalized adjacency

    x = jax.random.normal(k_x, (N, F_IN), dtype=jnp.float32)

    # Deterministic parameter init (PyTorch nn.Linear shapes: weight (out, in))
    def linear_init(kw, kb, out_dim, in_dim):
        bound = 1.0 / jnp.sqrt(in_dim)
        w = jax.random.uniform(kw, (out_dim, in_dim), minval=-bound, maxval=bound)
        b = jax.random.uniform(kb, (out_dim,), minval=-bound, maxval=bound)
        return w.astype(jnp.float32), b.astype(jnp.float32)

    w1, b1 = linear_init(k_w1, k_b1, HIDDEN, F_IN)
    w2, b2 = linear_init(k_w2, k_b2, HIDDEN, HIDDEN)
    w3, b3 = linear_init(k_w3, k_b3, NUM_CLASSES, HIDDEN)

    fwd = jax.jit(functools.partial(gcn_forward, num_classes=NUM_CLASSES))

    # One-time prep (outside the per-call path):
    #   f32 MXU-operand path (validation) and bf16 path (production).
    params_f32 = prepare_params(w1, b1, w2, b2, w3, b3, matmul_dtype=jnp.float32)
    params_bf16 = prepare_params(w1, b1, w2, b2, w3, b3, matmul_dtype=jnp.bfloat16)
    a_f32 = prepare_graph(a, matmul_dtype=jnp.float32)
    a_bf16 = prepare_graph(a, matmul_dtype=jnp.bfloat16)

    out_f32 = jax.block_until_ready(fwd(a_f32, x, params_f32))
    out_bf16 = jax.block_until_ready(fwd(a_bf16, x, params_bf16))

    mimic_f32 = gcn_forward_ref(a_f32, x, params_f32, num_classes=NUM_CLASSES)
    mimic_bf16 = gcn_forward_ref(a_bf16, x, params_bf16, num_classes=NUM_CLASSES)
    ref_exact = reference_forward(a, x, w1, b1, w2, b2, w3, b3)

    assert out_f32.shape == (N, NUM_CLASSES)
    assert out_bf16.shape == (N, NUM_CLASSES)
    # Tight check: kernel matches its pure-JAX mirror (same dtypes / ordering).
    assert jnp.allclose(out_f32, mimic_f32, atol=1e-2, rtol=1e-2), \
        "f32 kernel != JAX mirror"
    assert jnp.allclose(out_bf16, mimic_bf16, atol=1e-2, rtol=1e-2), \
        "bf16 kernel != JAX mirror"
    # Semantic check: both paths reproduce the original module forward.
    assert jnp.allclose(out_f32, ref_exact, atol=5e-2, rtol=5e-2), \
        "f32 kernel != module forward"
    assert jnp.allclose(out_bf16, ref_exact, atol=5e-2, rtol=5e-2), \
        "bf16 kernel != module forward"

    print("KERNEL_OK")
</pallas_src>

<mosaic_0001>
module attributes {stable_mosaic.version = 11 : i64} {
  func.func @gcn_kernel(%arg0: memref<128x128xf32, #tpu.memory_space<vmem>>, %arg1: memref<128x128xf32, #tpu.memory_space<vmem>>, %arg2: memref<128x128xf32, #tpu.memory_space<vmem>>, %arg3: memref<1x128xf32, #tpu.memory_space<vmem>>, %arg4: memref<128x128xf32, #tpu.memory_space<vmem>>, %arg5: memref<1x128xf32, #tpu.memory_space<vmem>>, %arg6: memref<128x128xf32, #tpu.memory_space<vmem>>, %arg7: memref<1x128xf32, #tpu.memory_space<vmem>>, %arg8: memref<128x128xf32, #tpu.memory_space<vmem>>) attributes {dimension_semantics = [], scalar_prefetch = 0 : i64, scratch_operands = 0 : i64, tpu.core_type = #tpu.core_type<tc>} {
    %c0 = arith.constant 0 : index
    %c0_0 = arith.constant 0 : index
    %0 = vector.load %arg0[%c0, %c0_0] : memref<128x128xf32, #tpu.memory_space<vmem>>, vector<128x128xf32>
    %c0_1 = arith.constant 0 : index
    %c0_2 = arith.constant 0 : index
    %1 = vector.load %arg1[%c0_1, %c0_2] : memref<128x128xf32, #tpu.memory_space<vmem>>, vector<128x128xf32>
    %c0_3 = arith.constant 0 : index
    %c0_4 = arith.constant 0 : index
    %2 = vector.load %arg2[%c0_3, %c0_4] : memref<128x128xf32, #tpu.memory_space<vmem>>, vector<128x128xf32>
    %cst = arith.constant dense<0.000000e+00> : vector<128x128xf32>
    %3 = tpu.matmul %1, %2, %cst {dimension_numbers = #tpu.dot_dimension_numbers<[1], [0], [0], [1], [0, 0, 1, 1], [], []>} : vector<128x128xf32>, vector<128x128xf32>, vector<128x128xf32> -> vector<128x128xf32>
    %c0_5 = arith.constant 0 : index
    %c0_6 = arith.constant 0 : index
    %4 = vector.load %arg3[%c0_5, %c0_6] : memref<1x128xf32, #tpu.memory_space<vmem>>, vector<1x128xf32>
    %5 = vector.broadcast %4 : vector<1x128xf32> to vector<128x128xf32>
    %6 = arith.addf %3, %5 : vector<128x128xf32>
    %cst_7 = arith.constant dense<0.000000e+00> : vector<128x128xf32>
    %7 = tpu.matmul %0, %6, %cst_7 {dimension_numbers = #tpu.dot_dimension_numbers<[1], [0], [0], [1], [0, 0, 1, 1], [], []>} : vector<128x128xf32>, vector<128x128xf32>, vector<128x128xf32> -> vector<128x128xf32>
    %cst_8 = arith.constant 0.000000e+00 : f32
    %8 = vector.broadcast %cst_8 : f32 to vector<128x128xf32>
    %9 = arith.maximumf %7, %8 : vector<128x128xf32>
    %c0_9 = arith.constant 0 : index
    %c0_10 = arith.constant 0 : index
    %10 = vector.load %arg4[%c0_9, %c0_10] : memref<128x128xf32, #tpu.memory_space<vmem>>, vector<128x128xf32>
    %cst_11 = arith.constant dense<0.000000e+00> : vector<128x128xf32>
    %11 = tpu.matmul %9, %10, %cst_11 {dimension_numbers = #tpu.dot_dimension_numbers<[1], [0], [0], [1], [0, 0, 1, 1], [], []>} : vector<128x128xf32>, vector<128x128xf32>, vector<128x128xf32> -> vector<128x128xf32>
    %c0_12 = arith.constant 0 : index
    %c0_13 = arith.constant 0 : index
    %12 = vector.load %arg5[%c0_12, %c0_13] : memref<1x128xf32, #tpu.memory_space<vmem>>, vector<1x128xf32>
    %13 = vector.broadcast %12 : vector<1x128xf32> to vector<128x128xf32>
    %14 = arith.addf %11, %13 : vector<128x128xf32>
    %cst_14 = arith.constant dense<0.000000e+00> : vector<128x128xf32>
    %15 = tpu.matmul %0, %14, %cst_14 {dimension_numbers = #tpu.dot_dimension_numbers<[1], [0], [0], [1], [0, 0, 1, 1], [], []>} : vector<128x128xf32>, vector<128x128xf32>, vector<128x128xf32> -> vector<128x128xf32>
    %cst_15 = arith.constant 0.000000e+00 : f32
    %16 = vector.broadcast %cst_15 : f32 to vector<128x128xf32>
    %17 = arith.maximumf %15, %16 : vector<128x128xf32>
    %c0_16 = arith.constant 0 : index
    %c0_17 = arith.constant 0 : index
    %18 = vector.load %arg6[%c0_16, %c0_17] : memref<128x128xf32, #tpu.memory_space<vmem>>, vector<128x128xf32>
    %cst_18 = arith.constant dense<0.000000e+00> : vector<128x128xf32>
    %19 = tpu.matmul %17, %18, %cst_18 {dimension_numbers = #tpu.dot_dimension_numbers<[1], [0], [0], [1], [0, 0, 1, 1], [], []>} : vector<128x128xf32>, vector<128x128xf32>, vector<128x128xf32> -> vector<128x128xf32>
    %c0_19 = arith.constant 0 : index
    %c0_20 = arith.constant 0 : index
    %20 = vector.load %arg7[%c0_19, %c0_20] : memref<1x128xf32, #tpu.memory_space<vmem>>, vector<1x128xf32>
    %21 = vector.broadcast %20 : vector<1x128xf32> to vector<128x128xf32>
    %22 = arith.addf %19, %21 : vector<128x128xf32>
    %cst_21 = arith.constant dense<0xFF800000> : vector<128xf32>
    %23 = vector.multi_reduction <maximumf>, %22, %cst_21 [1] : vector<128x128xf32> to vector<128xf32>
    %24 = vector.shape_cast %23 : vector<128xf32> to vector<128x1xf32>
    %25 = vector.broadcast %24 : vector<128x1xf32> to vector<128x128xf32>
    %26 = arith.subf %22, %25 : vector<128x128xf32>
    %27 = math.exp %26 : vector<128x128xf32>
    %cst_22 = arith.constant dense<0.000000e+00> : vector<128xf32>
    %28 = vector.multi_reduction <add>, %27, %cst_22 [1] : vector<128x128xf32> to vector<128xf32>
    %29 = vector.shape_cast %28 : vector<128xf32> to vector<128x1xf32>
    %30 = math.log %29 : vector<128x1xf32>
    %31 = vector.broadcast %30 : vector<128x1xf32> to vector<128x128xf32>
    %32 = arith.subf %26, %31 : vector<128x128xf32>
    %c0_23 = arith.constant 0 : index
    %c0_24 = arith.constant 0 : index
    %33 = vector.load %arg8[%c0_23, %c0_24] : memref<128x128xf32, #tpu.memory_space<vmem>>, vector<128x128xf32>
    tpu.vector_store %arg8[%c0_23, %c0_24], %32 {strides = array<i32>} : memref<128x128xf32, #tpu.memory_space<vmem>>, vector<128x128xf32>,
    return
  }
}

</mosaic_0001>

<bundles_post_ra>
// kernel: gcn_forward.1
= control target key start
LH: loop header
LB: loop body
LE: loop exit
PB: predicated region body
PF: predicated region fallthrough
CT: control target
= control target key end

     0   :  { %13 = vsyncpa [#allocation3], 0  ;;  %s2156_s0 = inlined_call_operand.vmem [shape: f32[128,128], index: 0, kind: input, shape index: {}]   ;;  %s2157_s1 = inlined_call_operand.vmem [shape: f32[128,128], index: 1, kind: input, shape index: {}]   ;;  %s2158_s2 = inlined_call_operand.hbm [shape: f32[128,128], index: 2, kind: input, shape index: {}]   ;;  %s2159_s3 = inlined_call_operand.vmem [shape: f32[1,128], index: 3, kind: input, shape index: {}]   ;;  %s2160_s4 = inlined_call_operand.hbm [shape: f32[128,128], index: 4, kind: input, shape index: {}]   ;;  %s2161_s5 = inlined_call_operand.vmem [shape: f32[1,128], index: 5, kind: input, shape index: {}]   ;;  %s2162_s6 = inlined_call_operand.hbm [shape: f32[128,128], index: 6, kind: input, shape index: {}]   ;;  %s2163_s7 = inlined_call_operand.vmem [shape: f32[1,128], index: 7, kind: input, shape index: {}]   ;;  %s2164_s8 = inlined_call_operand.vmem [shape: f32[128,128], index: 8, kind: output, shape index: {}]  }
   0x1   :  { %14 = vsyncpa [#allocation5], 0  ;;  %s1718_s27 = smov [#allocation4]   ;;  %s1719_s29 = smov [#allocation2]  }
   0x2   :  { %s38_s28 = sshll.u32 %s1718_s27, 4  ;;  %s24_s30 = sshll.u32 %s1719_s29, 4  ;;  %s39_s28 = int_to_ptr.vmem [resolvable:$true] %s38_s28  ;;  %s25_s30 = int_to_ptr.vmem [resolvable:$true] %s24_s30 }
   0x3   :  { %s1662_s9 = scalar_lea.vmem %s39_s28, 2048  ;;  %p1667_p1 = scmp.lt.s32.totalorder %s39_s28, %s39_s28 }
   0x4   :  { %p1663_p0 = scmp.ne.s32.totalorder %s39_s28, %s1662_s9  ;;  %p1668_p2 = scmp.lt.s32.totalorder %s1662_s9, %s1662_s9 }
   0x6   :  { %p1669_p3 = por %p1668_p2, %p1667_p1 }
   0x8   :  { %p1670_p4 = pnand %p1669_p3, %p1663_p0 }
   0xa   :  { %1673 = shalt.err (!%p1670_p4)
}
   0xb   :  { %s1720_s10 = smov 128   ;;  %s1721_s11 = smov 8  }
   0xc   :  { %44 = dma.hbm_to_vmem [thread:$0]  %s2160_s4, 2048, %s39_s28, [#allocation5], %s1720_s10, %s1720_s10, %s1721_s11  }
   0xd   :  { %s1682_s14 = scalar_lea.vmem %s25_s30, 2048  ;;  %p1687_p6 = scmp.lt.s32.totalorder %s25_s30, %s25_s30 }
   0xe   :  { %p1683_p5 = scmp.ne.s32.totalorder %s25_s30, %s1682_s14  ;;  %p1688_p7 = scmp.lt.s32.totalorder %s1682_s14, %s1682_s14 }
  0x10   :  { %p1689_p8 = por %p1688_p7, %p1687_p6 }
  0x12   :  { %p1690_p9 = pnand %p1689_p8, %p1683_p5 }
  0x14   :  { %1693 = shalt.err (!%p1690_p9)
}
  0x15   :  { %30 = dma.hbm_to_vmem [thread:$0]  %s2158_s2, 2048, %s25_s30, [#allocation3], %s1720_s10, %s1720_s10, %s1721_s11  }
  0x16   :  { %s1722_s17 = smov [#allocation6]  }
  0x17   :  { %s52_s18 = sshll.u32 %s1722_s17, 4  ;;  %s53_s18 = int_to_ptr.vmem [resolvable:$true] %s52_s18 }
  0x18   :  { %s1702_s19 = scalar_lea.vmem %s53_s18, 2048  ;;  %p1707_p11 = scmp.lt.s32.totalorder %s53_s18, %s53_s18 }
  0x19   :  { %p1703_p10 = scmp.ne.s32.totalorder %s53_s18, %s1702_s19  ;;  %p1708_p12 = scmp.lt.s32.totalorder %s1702_s19, %s1702_s19 }
  0x1b   :  { %p1709_p13 = por %p1708_p12, %p1707_p11 }
  0x1d   :  { %p1710_p0 = pnand %p1709_p13, %p1703_p10 }
  0x1f   :  { %1713 = shalt.err (!%p1710_p0)
}
  0x20   :  { %58 = dma.hbm_to_vmem [thread:$0]  %s2162_s6, 2048, %s53_s18, [#allocation5], %s1720_s10, %s1720_s10, %s1721_s11  }
  0x21   :  { %1714 = dma.done.wait [#allocation3], 2048  }
  0x22   :  { %1715 = vsyncadd [#allocation3], 4294965248 }
  0x23   :  { %1716 = dma.done.wait [#allocation5], 4096  }
  0x24   :  { %1717 = vsyncadd [#allocation5], 4294963200  ;;  %v117_v0 = vld [vmem:[#allocation2 + $0x78] sm:$0xff]  ;;  %v116_v1 = vld [vmem:[#allocation2 + $0x70] sm:$0xff] }
  0x25   :  { %1273 = vmatprep.subr.mxu0 %v117_v0  ;;  %v115_v2 = vld [vmem:[#allocation2 + $0x68] sm:$0xff]  ;;  %v114_v3 = vld [vmem:[#allocation2 + $0x60] sm:$0xff]  ;;  %v113_v5 = vld [vmem:[#allocation2 + $0x58] sm:$0xff] }
  0x26   :  { %1274 = vmatpush3.msra.mxu0 %v117_v0  ;;  %v86_v4 = vld [vmem:[%s2157_s1] sm:$0xff]  ;;  %v112_v6 = vld [vmem:[#allocation2 + $0x50] sm:$0xff]  ;;  %v111_v7 = vld [vmem:[#allocation2 + $0x48] sm:$0xff] }
  0x27   :  { %1275 = vmatprep.subr.mxu0 %v116_v1  ;;  %1305 = vmatprep.mubr.f32.mxu0 %v86_v4  ;;  %v110_v8 = vld [vmem:[#allocation2 + $0x40] sm:$0xff]  ;;  %v109_v9 = vld [vmem:[#allocation2 + $0x38] sm:$0xff]  ;;  %v108_v10 = vld [vmem:[#allocation2 + $0x30] sm:$0xff] }
  0x28   :  { %1276 = vmatpush3.msra.mxu0 %v116_v1  ;;  %v107_v11 = vld [vmem:[#allocation2 + $0x28] sm:$0xff]  ;;  %v106_v12 = vld [vmem:[#allocation2 + $0x20] sm:$0xff]  ;;  %v105_v13 = vld [vmem:[#allocation2 + $0x18] sm:$0xff] }
  0x29   :  { %1277 = vmatprep.subr.mxu0 %v115_v2  ;;  %v104_v14 = vld [vmem:[#allocation2 + $0x10] sm:$0xff]  ;;  %v103_v15 = vld [vmem:[#allocation2 + $0x8] sm:$0xff]  ;;  %v102_v16 = vld [vmem:[#allocation2] sm:$0xff] }
  0x2a   :  { %1278 = vmatpush3.msra.mxu0 %v115_v2  ;;  %v87_v17 = vld [vmem:[%s2157_s1 + $0x8] sm:$0xff]  ;;  %v88_v18 = vld [vmem:[%s2157_s1 + $0x10] sm:$0xff]  ;;  %v89_v19 = vld [vmem:[%s2157_s1 + $0x18] sm:$0xff] }
  0x2b   :  { %1279 = vmatprep.subr.mxu0 %v114_v3  ;;  %v90_v20 = vld [vmem:[%s2157_s1 + $0x20] sm:$0xff]  ;;  %v91_v21 = vld [vmem:[%s2157_s1 + $0x28] sm:$0xff]  ;;  %v92_v22 = vld [vmem:[%s2157_s1 + $0x30] sm:$0xff] }
  0x2c   :  { %1280 = vmatpush3.msra.mxu0 %v114_v3  ;;  %v93_v23 = vld [vmem:[%s2157_s1 + $0x38] sm:$0xff]  ;;  %v94_v24 = vld [vmem:[%s2157_s1 + $0x40] sm:$0xff]  ;;  %v95_v25 = vld [vmem:[%s2157_s1 + $0x48] sm:$0xff] }
  0x2d   :  { %1281 = vmatprep.subr.mxu0 %v113_v5  ;;  %v96_v26 = vld [vmem:[%s2157_s1 + $0x50] sm:$0xff]  ;;  %v97_v27 = vld [vmem:[%s2157_s1 + $0x58] sm:$0xff]  ;;  %v98_v28 = vld [vmem:[%s2157_s1 + $0x60] sm:$0xff] }
  0x2e   :  { %1282 = vmatpush3.msra.mxu0 %v113_v5  ;;  %v99_v29 = vld [vmem:[%s2157_s1 + $0x68] sm:$0xff]  ;;  %v100_v30 = vld [vmem:[%s2157_s1 + $0x70] sm:$0xff]  ;;  %v101_v31 = vld [vmem:[%s2157_s1 + $0x78] sm:$0xff] }
  0x2f   :  { %1283 = vmatprep.subr.mxu0 %v112_v6  ;;  %v1828_v32 = vld [vmem:[%s2156_s0] sm:$0xff]  ;;  %v446_v33 = vld [vmem:[#allocation4 + $0x78] sm:$0xff]  ;;  %v445_v34 = vld [vmem:[#allocation4 + $0x70] sm:$0xff] }
  0x30   :  { %1284 = vmatpush3.msra.mxu0 %v112_v6  ;;  %1361 = vmatprep.mubr.f32.mxu1 %v1828_v32  ;;  %v444_v35 = vld [vmem:[#allocation4 + $0x68] sm:$0xff]  ;;  %v443_v36 = vld [vmem:[#allocation4 + $0x60] sm:$0xff]  ;;  %v442_v37 = vld [vmem:[#allocation4 + $0x58] sm:$0xff] }
  0x31   :  { %1285 = vmatprep.subr.mxu0 %v111_v7  ;;  %v441_v38 = vld [vmem:[#allocation4 + $0x50] sm:$0xff]  ;;  %v440_v39 = vld [vmem:[#allocation4 + $0x48] sm:$0xff]  ;;  %v439_v40 = vld [vmem:[#allocation4 + $0x40] sm:$0xff] }
  0x32   :  { %1286 = vmatpush3.msra.mxu0 %v111_v7  ;;  %v438_v41 = vld [vmem:[#allocation4 + $0x38] sm:$0xff]  ;;  %v437_v42 = vld [vmem:[#allocation4 + $0x30] sm:$0xff]  ;;  %v436_v43 = vld [vmem:[#allocation4 + $0x28] sm:$0xff] }
  0x33   :  { %1287 = vmatprep.subr.mxu0 %v110_v8  ;;  %v435_v44 = vld [vmem:[#allocation4 + $0x20] sm:$0xff]  ;;  %v434_v45 = vld [vmem:[#allocation4 + $0x18] sm:$0xff] }
  0x34   :  { %1288 = vmatpush3.msra.mxu0 %v110_v8  ;;  %v1110_v60 = vld [vmem:[%s2159_s3] ss:$0 sm:$0xff] }
  0x35   :  { %1289 = vmatprep.subr.mxu0 %v109_v9 }
  0x36   :  { %1290 = vmatpush3.msra.mxu0 %v109_v9 }
  0x37   :  { %1291 = vmatprep.subr.mxu0 %v108_v10 }
  0x38   :  { %1292 = vmatpush3.msra.mxu0 %v108_v10 }
  0x39   :  { %1293 = vmatprep.subr.mxu0 %v107_v11 }
  0x3a   :  { %1294 = vmatpush3.msra.mxu0 %v107_v11 }
  0x3b   :  { %1295 = vmatprep.subr.mxu0 %v106_v12 }
  0x3c   :  { %1296 = vmatpush3.msra.mxu0 %v106_v12 }
  0x3d   :  { %1297 = vmatprep.subr.mxu0 %v105_v13 }
  0x3e   :  { %1298 = vmatpush3.msra.mxu0 %v105_v13 }
  0x3f   :  { %1299 = vmatprep.subr.mxu0 %v104_v14 }
  0x40   :  { %1300 = vmatpush3.msra.mxu0 %v104_v14 }
  0x41   :  { %1301 = vmatprep.subr.mxu0 %v103_v15 }
  0x42   :  { %1302 = vmatpush3.msra.mxu0 %v103_v15  ;;  %v1837_v15 = vld [vmem:[%s2156_s0 + $0x8] sm:$0xff] }
  0x43   :  { %1303 = vmatprep.subr.mxu0 %v102_v16 }
  0x44   :  { %1304 = vmatpush3.msra.mxu0 %v102_v16  ;;  %v1842_v16 = vld [vmem:[%s2156_s0 + $0x10] sm:$0xff] }
  0x45   :  { %1306 = vmatmul.mubr.f32.vlgmr.msra.gmra.mxu0 %v87_v17  ;;  %1385 = vmatprep.subr.mxu0 %v446_v33  ;;  %v1849_v17 = vld [vmem:[%s2156_s0 + $0x18] sm:$0xff] }
  0x46   :  { %1308 = vmatprep.mubr.f32.mxu0 %v88_v18  ;;  %1386 = vmatpush3.msra.mxu0 %v446_v33  ;;  %v1854_v18 = vld [vmem:[%s2156_s0 + $0x20] sm:$0xff] }
  0x47   :  { %1387 = vmatprep.subr.mxu0 %v445_v34  ;;  %v431_v33 = vld [vmem:[#allocation4] sm:$0xff] }
  0x48   :  { %1388 = vmatpush3.msra.mxu0 %v445_v34 }
  0x49   :  { %1309 = vmatmul.mubr.f32.gmra.mxu0 %v89_v19  ;;  %1389 = vmatprep.subr.mxu0 %v444_v35  ;;  %v1861_v19 = vld [vmem:[%s2156_s0 + $0x28] sm:$0xff] }
  0x4a   :  { %1311 = vmatprep.mubr.f32.mxu0 %v90_v20  ;;  %1390 = vmatpush3.msra.mxu0 %v444_v35  ;;  %v1866_v20 = vld [vmem:[%s2156_s0 + $0x30] sm:$0xff] }
  0x4b   :  { %1391 = vmatprep.subr.mxu0 %v443_v36 }
  0x4c   :  { %1392 = vmatpush3.msra.mxu0 %v443_v36 }
  0x4d   :  { %1312 = vmatmul.mubr.f32.gmra.mxu0 %v91_v21  ;;  %1393 = vmatprep.subr.mxu0 %v442_v37  ;;  %v1873_v21 = vld [vmem:[%s2156_s0 + $0x38] sm:$0xff] }
  0x4e   :  { %1314 = vmatprep.mubr.f32.mxu0 %v92_v22  ;;  %1394 = vmatpush3.msra.mxu0 %v442_v37  ;;  %v1878_v22 = vld [vmem:[%s2156_s0 + $0x40] sm:$0xff] }
  0x4f   :  { %1395 = vmatprep.subr.mxu0 %v441_v38 }
  0x50   :  { %1396 = vmatpush3.msra.mxu0 %v441_v38 }
  0x51   :  { %1315 = vmatmul.mubr.f32.gmra.mxu0 %v93_v23  ;;  %1397 = vmatprep.subr.mxu0 %v440_v39  ;;  %v1885_v23 = vld [vmem:[%s2156_s0 + $0x48] sm:$0xff] }
  0x52   :  { %1317 = vmatprep.mubr.f32.mxu0 %v94_v24  ;;  %1398 = vmatpush3.msra.mxu0 %v440_v39  ;;  %v1890_v24 = vld [vmem:[%s2156_s0 + $0x50] sm:$0xff] }
  0x53   :  { %1399 = vmatprep.subr.mxu0 %v439_v40 }
  0x54   :  { %1400 = vmatpush3.msra.mxu0 %v439_v40 }
  0x55   :  { %1318 = vmatmul.mubr.f32.gmra.mxu0 %v95_v25  ;;  %1401 = vmatprep.subr.mxu0 %v438_v41  ;;  %v1897_v25 = vld [vmem:[%s2156_s0 + $0x58] sm:$0xff] }
  0x56   :  { %1320 = vmatprep.mubr.f32.mxu0 %v96_v26  ;;  %1402 = vmatpush3.msra.mxu0 %v438_v41  ;;  %v1902_v26 = vld [vmem:[%s2156_s0 + $0x60] sm:$0xff] }
  0x57   :  { %1403 = vmatprep.subr.mxu0 %v437_v42 }
  0x58   :  { %1404 = vmatpush3.msra.mxu0 %v437_v42 }
  0x59   :  { %1321 = vmatmul.mubr.f32.gmra.mxu0 %v97_v27  ;;  %1405 = vmatprep.subr.mxu0 %v436_v43  ;;  %v1909_v27 = vld [vmem:[%s2156_s0 + $0x68] sm:$0xff] }
  0x5a   :  { %1323 = vmatprep.mubr.f32.mxu0 %v98_v28  ;;  %1406 = vmatpush3.msra.mxu0 %v436_v43  ;;  %v1914_v28 = vld [vmem:[%s2156_s0 + $0x70] sm:$0xff] }
  0x5b   :  { %1407 = vmatprep.subr.mxu0 %v435_v44 }
  0x5c   :  { %1408 = vmatpush3.msra.mxu0 %v435_v44 }
  0x5d   :  { %1324 = vmatmul.mubr.f32.gmra.mxu0 %v99_v29  ;;  %1409 = vmatprep.subr.mxu0 %v434_v45  ;;  %v1921_v29 = vld [vmem:[%s2156_s0 + $0x78] sm:$0xff] }
  0x5e   :  { %1326 = vmatprep.mubr.f32.mxu0 %v100_v30  ;;  %1410 = vmatpush3.msra.mxu0 %v434_v45  ;;  %v433_v30 = vld [vmem:[#allocation4 + $0x10] sm:$0xff] }
  0x5f   :  { %1411 = vmatprep.subr.mxu0 %v433_v30 }
  0x60   :  { %1412 = vmatpush3.msra.mxu0 %v433_v30 }
  0x61   :  { %1327 = vmatmul.mubr.f32.gmra.mxu0 %v101_v31  ;;  %v432_v31 = vld [vmem:[#allocation4 + $0x8] sm:$0xff] }
  0x62   :  { %1413 = vmatprep.subr.mxu0 %v432_v31 }
  0x63   :  { %1414 = vmatpush3.msra.mxu0 %v432_v31 }
  0x64   :  { %1415 = vmatprep.subr.mxu0 %v431_v33 }
  0x65   :  { %1416 = vmatpush3.msra.mxu0 %v431_v33 }
 0x105   :  { %v1307_v46 = vpop.f32.mrf.mxu0 }
 0x106   :  { %v197_v13 = vadd.f32 %v1307_v46, %v1110_v60 }
 0x107   :  { %v191_v47 = vpop.f32.mrf.mxu0 }
 0x108   :  { %v192_v14 = vadd.f32 %v1110_v60, %v191_v47 }
 0x109   :  { %v1310_v48 = vpop.f32.mrf.mxu0 }
 0x10a   :  { %v207_v11 = vadd.f32 %v1310_v48, %v1110_v60 }
 0x10b   :  { %v201_v49 = vpop.f32.mrf.mxu0 }
 0x10c   :  { %v202_v12 = vadd.f32 %v1110_v60, %v201_v49 }
 0x10d   :  { %v1313_v50 = vpop.f32.mrf.mxu0 }
 0x10e   :  { %v217_v9 = vadd.f32 %v1313_v50, %v1110_v60 }
 0x10f   :  { %v211_v51 = vpop.f32.mrf.mxu0 }
 0x110   :  { %v212_v10 = vadd.f32 %v1110_v60, %v211_v51 }
 0x111   :  { %v1316_v52 = vpop.f32.mrf.mxu0 }
 0x112   :  { %v227_v7 = vadd.f32 %v1316_v52, %v1110_v60 }
 0x113   :  { %v221_v53 = vpop.f32.mrf.mxu0 }
 0x114   :  { %v222_v8 = vadd.f32 %v1110_v60, %v221_v53 }
 0x115   :  { %v1319_v54 = vpop.f32.mrf.mxu0 }
 0x116   :  { %v237_v5 = vadd.f32 %v1319_v54, %v1110_v60 }
 0x117   :  { %v231_v55 = vpop.f32.mrf.mxu0 }
 0x118   :  { %v232_v6 = vadd.f32 %v1110_v60, %v231_v55 }
 0x119   :  { %v1322_v56 = vpop.f32.mrf.mxu0 }
 0x11a   :  { %v247_v3 = vadd.f32 %v1322_v56, %v1110_v60 }
 0x11b   :  { %v241_v57 = vpop.f32.mrf.mxu0 }
 0x11c   :  { %v242_v4 = vadd.f32 %v1110_v60, %v241_v57 }
 0x11d   :  { %v1325_v58 = vpop.f32.mrf.mxu0 }
 0x11e   :  { %v257_v1 = vadd.f32 %v1325_v58, %v1110_v60 }
 0x11f   :  { %v251_v59 = vpop.f32.mrf.mxu0 }
 0x120   :  { %v252_v2 = vadd.f32 %v1110_v60, %v251_v59 }
 0x121   :  { %v1328_v61 = vpop.f32.mrf.mxu0 }
 0x122   :  { %v267_v62 = vadd.f32 %v1328_v61, %v1110_v60 }
 0x123   :  { %v261_v63 = vpop.f32.mrf.mxu0 }
 0x124   :  { %v262_v0 = vadd.f32 %v1110_v60, %v261_v63  ;;  %1329 = vmatprep.subr.mxu1 %v267_v62 }
 0x125   :  { %1330 = vmatpush3.msra.mxu1 %v267_v62 }
 0x126   :  { %1331 = vmatprep.subr.mxu1 %v262_v0 }
 0x127   :  { %1332 = vmatpush3.msra.mxu1 %v262_v0 }
 0x128   :  { %1333 = vmatprep.subr.mxu1 %v257_v1 }
 0x129   :  { %1334 = vmatpush3.msra.mxu1 %v257_v1  ;;  %v1925_v1 = vld [vmem:[#allocation6 + $0x78] sm:$0xff] }
 0x12a   :  { %1335 = vmatprep.subr.mxu1 %v252_v2  ;;  %1497 = vmatprep.subr.mxu0 %v1925_v1 }
 0x12b   :  { %1336 = vmatpush3.msra.mxu1 %v252_v2  ;;  %v1927_v2 = vld [vmem:[#allocation6 + $0x70] sm:$0xff] }
 0x12c   :  { %1337 = vmatprep.subr.mxu1 %v247_v3 }
 0x12d   :  { %1338 = vmatpush3.msra.mxu1 %v247_v3  ;;  %v1931_v3 = vld [vmem:[#allocation6 + $0x68] sm:$0xff] }
 0x12e   :  { %1339 = vmatprep.subr.mxu1 %v242_v4 }
 0x12f   :  { %1340 = vmatpush3.msra.mxu1 %v242_v4  ;;  %v1935_v4 = vld [vmem:[#allocation6 + $0x60] sm:$0xff] }
 0x130   :  { %1341 = vmatprep.subr.mxu1 %v237_v5 }
 0x131   :  { %1342 = vmatpush3.msra.mxu1 %v237_v5  ;;  %v1939_v5 = vld [vmem:[#allocation6 + $0x58] sm:$0xff] }
 0x132   :  { %1343 = vmatprep.subr.mxu1 %v232_v6 }
 0x133   :  { %1344 = vmatpush3.msra.mxu1 %v232_v6  ;;  %v1943_v6 = vld [vmem:[#allocation6 + $0x50] sm:$0xff] }
 0x134   :  { %1345 = vmatprep.subr.mxu1 %v227_v7 }
 0x135   :  { %1346 = vmatpush3.msra.mxu1 %v227_v7  ;;  %v1947_v7 = vld [vmem:[#allocation6 + $0x48] sm:$0xff] }
 0x136   :  { %1347 = vmatprep.subr.mxu1 %v222_v8 }
 0x137   :  { %1348 = vmatpush3.msra.mxu1 %v222_v8  ;;  %v1951_v8 = vld [vmem:[#allocation6 + $0x40] sm:$0xff] }
 0x138   :  { %1349 = vmatprep.subr.mxu1 %v217_v9 }
 0x139   :  { %1350 = vmatpush3.msra.mxu1 %v217_v9  ;;  %v1955_v9 = vld [vmem:[#allocation6 + $0x38] sm:$0xff] }
 0x13a   :  { %1351 = vmatprep.subr.mxu1 %v212_v10 }
 0x13b   :  { %1352 = vmatpush3.msra.mxu1 %v212_v10  ;;  %v1959_v10 = vld [vmem:[#allocation6 + $0x30] sm:$0xff] }
 0x13c   :  { %1353 = vmatprep.subr.mxu1 %v207_v11 }
 0x13d   :  { %1354 = vmatpush3.msra.mxu1 %v207_v11  ;;  %v1963_v11 = vld [vmem:[#allocation6 + $0x28] sm:$0xff] }
 0x13e   :  { %1355 = vmatprep.subr.mxu1 %v202_v12 }
 0x13f   :  { %1356 = vmatpush3.msra.mxu1 %v202_v12  ;;  %v1967_v12 = vld [vmem:[#allocation6 + $0x20] sm:$0xff] }
 0x140   :  { %1357 = vmatprep.subr.mxu1 %v197_v13 }
 0x141   :  { %1358 = vmatpush3.msra.mxu1 %v197_v13  ;;  %v1971_v13 = vld [vmem:[#allocation6 + $0x18] sm:$0xff] }
 0x142   :  { %1359 = vmatprep.subr.mxu1 %v192_v14 }
 0x143   :  { %1360 = vmatpush3.msra.mxu1 %v192_v14 }
 0x144   :  { %1362 = vmatmul.mubr.f32.vlgmr.msra.gmra.mxu1 %v1837_v15 }
 0x145   :  { %1364 = vmatprep.mubr.f32.mxu1 %v1842_v16 }
 0x148   :  { %1365 = vmatmul.mubr.f32.gmra.mxu1 %v1849_v17 }
 0x149   :  { %1367 = vmatprep.mubr.f32.mxu1 %v1854_v18 }
 0x14c   :  { %1368 = vmatmul.mubr.f32.gmra.mxu1 %v1861_v19 }
 0x14d   :  { %1370 = vmatprep.mubr.f32.mxu1 %v1866_v20 }
 0x150   :  { %1371 = vmatmul.mubr.f32.gmra.mxu1 %v1873_v21 }
 0x151   :  { %1373 = vmatprep.mubr.f32.mxu1 %v1878_v22 }
 0x154   :  { %1374 = vmatmul.mubr.f32.gmra.mxu1 %v1885_v23 }
 0x155   :  { %1376 = vmatprep.mubr.f32.mxu1 %v1890_v24 }
 0x158   :  { %1377 = vmatmul.mubr.f32.gmra.mxu1 %v1897_v25 }
 0x159   :  { %1379 = vmatprep.mubr.f32.mxu1 %v1902_v26 }
 0x15c   :  { %1380 = vmatmul.mubr.f32.gmra.mxu1 %v1909_v27 }
 0x15d   :  { %1382 = vmatprep.mubr.f32.mxu1 %v1914_v28 }
 0x160   :  { %1383 = vmatmul.mubr.f32.gmra.mxu1 %v1921_v29 }
 0x161   :  { %1473 = vmatprep.mubr.f32.mxu1 %v1828_v32 }
 0x204   :  { %v1363_v34 = vpop.f32.mrf.mxu1 }
 0x205   :  { %v416_v37 = vmax.f32 %v1363_v34, 0.0 }
 0x206   :  { %v336_v35 = vpop.f32.mrf.mxu1 }
 0x207   :  { %v415_v36 = vmax.f32 %v336_v35, 0.0 }
 0x208   :  { %v1366_v38 = vpop.f32.mrf.mxu1 }
 0x209   :  { %1417 = vmatprep.mubr.f32.mxu0 %v415_v36  ;;  %v418_v41 = vmax.f32 %v1366_v38, 0.0 }
 0x20a   :  { %v346_v39 = vpop.f32.mrf.mxu1  ;;  %1418 = vmatmul.mubr.f32.vlgmr.msra.gmra.mxu0 %v416_v37 }
 0x20b   :  { %v417_v40 = vmax.f32 %v346_v39, 0.0  ;;  %1498 = vmatpush3.msra.mxu0 %v1925_v1 }
 0x20c   :  { %v1369_v32 = vpop.f32.mrf.mxu1  ;;  %1499 = vmatprep.subr.mxu0 %v1927_v2 }
 0x20d   :  { %1420 = vmatprep.mubr.f32.mxu0 %v417_v40  ;;  %v420_v44 = vmax.f32 %v1369_v32, 0.0  ;;  %1500 = vmatpush3.msra.mxu0 %v1927_v2 }
 0x20e   :  { %v356_v42 = vpop.f32.mrf.mxu1  ;;  %1421 = vmatmul.mubr.f32.gmra.mxu0 %v418_v41  ;;  %1501 = vmatprep.subr.mxu0 %v1931_v3 }
 0x20f   :  { %v419_v43 = vmax.f32 %v356_v42, 0.0  ;;  %1502 = vmatpush3.msra.mxu0 %v1931_v3 }
 0x210   :  { %v1372_v45 = vpop.f32.mrf.mxu1  ;;  %1503 = vmatprep.subr.mxu0 %v1935_v4 }
 0x211   :  { %1423 = vmatprep.mubr.f32.mxu0 %v419_v43  ;;  %v422_v48 = vmax.f32 %v1372_v45, 0.0  ;;  %1504 = vmatpush3.msra.mxu0 %v1935_v4  ;;  %v1111_v43 = vld [vmem:[%s2161_s5] ss:$0 sm:$0xff] }
 0x212   :  { %v366_v46 = vpop.f32.mrf.mxu1  ;;  %1424 = vmatmul.mubr.f32.gmra.mxu0 %v420_v44  ;;  %1505 = vmatprep.subr.mxu0 %v1939_v5 }
 0x213   :  { %v421_v47 = vmax.f32 %v366_v46, 0.0  ;;  %1506 = vmatpush3.msra.mxu0 %v1939_v5 }
 0x214   :  { %v1375_v49 = vpop.f32.mrf.mxu1  ;;  %1507 = vmatprep.subr.mxu0 %v1943_v6 }
 0x215   :  { %1426 = vmatprep.mubr.f32.mxu0 %v421_v47  ;;  %v424_v52 = vmax.f32 %v1375_v49, 0.0  ;;  %1508 = vmatpush3.msra.mxu0 %v1943_v6 }
 0x216   :  { %v376_v50 = vpop.f32.mrf.mxu1  ;;  %1427 = vmatmul.mubr.f32.gmra.mxu0 %v422_v48  ;;  %1509 = vmatprep.subr.mxu0 %v1947_v7 }
 0x217   :  { %v423_v51 = vmax.f32 %v376_v50, 0.0  ;;  %1510 = vmatpush3.msra.mxu0 %v1947_v7 }
 0x218   :  { %v1378_v53 = vpop.f32.mrf.mxu1  ;;  %1511 = vmatprep.subr.mxu0 %v1951_v8 }
 0x219   :  { %1429 = vmatprep.mubr.f32.mxu0 %v423_v51  ;;  %v426_v56 = vmax.f32 %v1378_v53, 0.0  ;;  %1512 = vmatpush3.msra.mxu0 %v1951_v8 }
 0x21a   :  { %v386_v54 = vpop.f32.mrf.mxu1  ;;  %1430 = vmatmul.mubr.f32.gmra.mxu0 %v424_v52  ;;  %1513 = vmatprep.subr.mxu0 %v1955_v9 }
 0x21b   :  { %v425_v55 = vmax.f32 %v386_v54, 0.0  ;;  %1514 = vmatpush3.msra.mxu0 %v1955_v9 }
 0x21c   :  { %v1381_v57 = vpop.f32.mrf.mxu1  ;;  %1515 = vmatprep.subr.mxu0 %v1959_v10 }
 0x21d   :  { %1432 = vmatprep.mubr.f32.mxu0 %v425_v55  ;;  %v428_v60 = vmax.f32 %v1381_v57, 0.0  ;;  %1516 = vmatpush3.msra.mxu0 %v1959_v10 }
 0x21e   :  { %v396_v58 = vpop.f32.mrf.mxu1  ;;  %1433 = vmatmul.mubr.f32.gmra.mxu0 %v426_v56  ;;  %1517 = vmatprep.subr.mxu0 %v1963_v11 }
 0x21f   :  { %v427_v59 = vmax.f32 %v396_v58, 0.0  ;;  %1518 = vmatpush3.msra.mxu0 %v1963_v11 }
 0x220   :  { %v1384_v61 = vpop.f32.mrf.mxu1  ;;  %1519 = vmatprep.subr.mxu0 %v1967_v12 }
 0x221   :  { %1435 = vmatprep.mubr.f32.mxu0 %v427_v59  ;;  %v430_v0 = vmax.f32 %v1384_v61, 0.0  ;;  %1520 = vmatpush3.msra.mxu0 %v1967_v12 }
 0x222   :  { %v406_v62 = vpop.f32.mrf.mxu1  ;;  %1436 = vmatmul.mubr.f32.gmra.mxu0 %v428_v60  ;;  %1521 = vmatprep.subr.mxu0 %v1971_v13 }
 0x223   :  { %v429_v63 = vmax.f32 %v406_v62, 0.0  ;;  %1522 = vmatpush3.msra.mxu0 %v1971_v13 }
 0x225   :  { %1438 = vmatprep.mubr.f32.mxu0 %v429_v63 }
 0x226   :  { %1439 = vmatmul.mubr.f32.gmra.mxu0 %v430_v0 }
 0x2ca   :  { %v1419_v14 = vpop.f32.mrf.mxu0 }
 0x2cb   :  { %v526_v60 = vadd.f32 %v1419_v14, %v1111_v43 }
 0x2cc   :  { %v520_v30 = vpop.f32.mrf.mxu0 }
 0x2cd   :  { %v521_v61 = vadd.f32 %v1111_v43, %v520_v30 }
 0x2ce   :  { %v1422_v31 = vpop.f32.mrf.mxu0 }
 0x2cf   :  { %v536_v58 = vadd.f32 %v1422_v31, %v1111_v43 }
 0x2d0   :  { %v530_v33 = vpop.f32.mrf.mxu0 }
 0x2d1   :  { %v531_v59 = vadd.f32 %v1111_v43, %v530_v33 }
 0x2d2   :  { %v1425_v34 = vpop.f32.mrf.mxu0 }
 0x2d3   :  { %v546_v56 = vadd.f32 %v1425_v34, %v1111_v43  ;;  %v1112_v34 = vld [vmem:[%s2163_s7] ss:$0 sm:$0xff] }
 0x2d4   :  { %v540_v35 = vpop.f32.mrf.mxu0 }
 0x2d5   :  { %v541_v57 = vadd.f32 %v1111_v43, %v540_v35 }
 0x2d6   :  { %v1428_v36 = vpop.f32.mrf.mxu0 }
 0x2d7   :  { %v556_v54 = vadd.f32 %v1428_v36, %v1111_v43 }
 0x2d8   :  { %v550_v37 = vpop.f32.mrf.mxu0 }
 0x2d9   :  { %v551_v55 = vadd.f32 %v1111_v43, %v550_v37 }
 0x2da   :  { %v1431_v38 = vpop.f32.mrf.mxu0 }
 0x2db   :  { %v566_v52 = vadd.f32 %v1431_v38, %v1111_v43 }
 0x2dc   :  { %v560_v39 = vpop.f32.mrf.mxu0 }
 0x2dd   :  { %v561_v53 = vadd.f32 %v1111_v43, %v560_v39 }
 0x2de   :  { %v1434_v40 = vpop.f32.mrf.mxu0 }
 0x2df   :  { %v576_v50 = vadd.f32 %v1434_v40, %v1111_v43 }
 0x2e0   :  { %v570_v41 = vpop.f32.mrf.mxu0 }
 0x2e1   :  { %v571_v51 = vadd.f32 %v1111_v43, %v570_v41 }
 0x2e2   :  { %v1437_v32 = vpop.f32.mrf.mxu0 }
 0x2e3   :  { %v586_v48 = vadd.f32 %v1437_v32, %v1111_v43 }
 0x2e4   :  { %v580_v42 = vpop.f32.mrf.mxu0 }
 0x2e5   :  { %v581_v49 = vadd.f32 %v1111_v43, %v580_v42 }
 0x2e6   :  { %v1440_v44 = vpop.f32.mrf.mxu0 }
 0x2e7   :  { %v596_v45 = vadd.f32 %v1440_v44, %v1111_v43 }
 0x2e8   :  { %v590_v46 = vpop.f32.mrf.mxu0 }
 0x2e9   :  { %v591_v47 = vadd.f32 %v1111_v43, %v590_v46  ;;  %1441 = vmatprep.subr.mxu1 %v596_v45 }
 0x2ea   :  { %1442 = vmatpush3.msra.mxu1 %v596_v45 }
 0x2eb   :  { %1443 = vmatprep.subr.mxu1 %v591_v47 }
 0x2ec   :  { %1444 = vmatpush3.msra.mxu1 %v591_v47 }
 0x2ed   :  { %1445 = vmatprep.subr.mxu1 %v586_v48 }
 0x2ee   :  { %1446 = vmatpush3.msra.mxu1 %v586_v48 }
 0x2ef   :  { %1447 = vmatprep.subr.mxu1 %v581_v49 }
 0x2f0   :  { %1448 = vmatpush3.msra.mxu1 %v581_v49 }
 0x2f1   :  { %1449 = vmatprep.subr.mxu1 %v576_v50 }
 0x2f2   :  { %1450 = vmatpush3.msra.mxu1 %v576_v50 }
 0x2f3   :  { %1451 = vmatprep.subr.mxu1 %v571_v51 }
 0x2f4   :  { %1452 = vmatpush3.msra.mxu1 %v571_v51 }
 0x2f5   :  { %1453 = vmatprep.subr.mxu1 %v566_v52 }
 0x2f6   :  { %1454 = vmatpush3.msra.mxu1 %v566_v52 }
 0x2f7   :  { %1455 = vmatprep.subr.mxu1 %v561_v53 }
 0x2f8   :  { %1456 = vmatpush3.msra.mxu1 %v561_v53 }
 0x2f9   :  { %1457 = vmatprep.subr.mxu1 %v556_v54 }
 0x2fa   :  { %1458 = vmatpush3.msra.mxu1 %v556_v54 }
 0x2fb   :  { %1459 = vmatprep.subr.mxu1 %v551_v55 }
 0x2fc   :  { %1460 = vmatpush3.msra.mxu1 %v551_v55 }
 0x2fd   :  { %1461 = vmatprep.subr.mxu1 %v546_v56 }
 0x2fe   :  { %1462 = vmatpush3.msra.mxu1 %v546_v56 }
 0x2ff   :  { %1463 = vmatprep.subr.mxu1 %v541_v57 }
 0x300   :  { %1464 = vmatpush3.msra.mxu1 %v541_v57 }
 0x301   :  { %1465 = vmatprep.subr.mxu1 %v536_v58 }
 0x302   :  { %1466 = vmatpush3.msra.mxu1 %v536_v58 }
 0x303   :  { %1467 = vmatprep.subr.mxu1 %v531_v59 }
 0x304   :  { %1468 = vmatpush3.msra.mxu1 %v531_v59 }
 0x305   :  { %1469 = vmatprep.subr.mxu1 %v526_v60 }
 0x306   :  { %1470 = vmatpush3.msra.mxu1 %v526_v60 }
 0x307   :  { %1471 = vmatprep.subr.mxu1 %v521_v61 }
 0x308   :  { %1472 = vmatpush3.msra.mxu1 %v521_v61 }
 0x309   :  { %1474 = vmatmul.mubr.f32.vlgmr.msra.gmra.mxu1 %v1837_v15  ;;  %1553 = vmatprep.subr.mxu1 %v1925_v1  ;;  %v762_v15 = vld [vmem:[#allocation6 + $0x10] sm:$0xff] }
 0x30a   :  { %1476 = vmatprep.mubr.f32.mxu1 %v1842_v16  ;;  %1569 = vmatpush3.msra.mxu1 %v1925_v1  ;;  %v761_v16 = vld [vmem:[#allocation6 + $0x8] sm:$0xff] }
 0x30b   :  { %1554 = vmatprep.subr.mxu1 %v1927_v2  ;;  %1523 = vmatprep.subr.mxu0 %v762_v15 }
 0x30c   :  { %1570 = vmatpush3.msra.mxu1 %v1927_v2  ;;  %1524 = vmatpush3.msra.mxu0 %v762_v15 }
 0x30d   :  { %1477 = vmatmul.mubr.f32.gmra.mxu1 %v1849_v17  ;;  %1555 = vmatprep.subr.mxu1 %v1931_v3  ;;  %v760_v17 = vld [vmem:[#allocation6] sm:$0xff] }
 0x30e   :  { %1479 = vmatprep.mubr.f32.mxu1 %v1854_v18  ;;  %1571 = vmatpush3.msra.mxu1 %v1931_v3 }
 0x30f   :  { %1556 = vmatprep.subr.mxu1 %v1935_v4  ;;  %1525 = vmatprep.subr.mxu0 %v761_v16 }
 0x310   :  { %1572 = vmatpush3.msra.mxu1 %v1935_v4  ;;  %1526 = vmatpush3.msra.mxu0 %v761_v16 }
 0x311   :  { %1480 = vmatmul.mubr.f32.gmra.mxu1 %v1861_v19  ;;  %1557 = vmatprep.subr.mxu1 %v1939_v5 }
 0x312   :  { %1482 = vmatprep.mubr.f32.mxu1 %v1866_v20  ;;  %1573 = vmatpush3.msra.mxu1 %v1939_v5 }
 0x313   :  { %1558 = vmatprep.subr.mxu1 %v1943_v6  ;;  %1527 = vmatprep.subr.mxu0 %v760_v17 }
 0x314   :  { %1574 = vmatpush3.msra.mxu1 %v1943_v6  ;;  %1528 = vmatpush3.msra.mxu0 %v760_v17 }
 0x315   :  { %1483 = vmatmul.mubr.f32.gmra.mxu1 %v1873_v21  ;;  %1559 = vmatprep.subr.mxu1 %v1947_v7 }
 0x316   :  { %1485 = vmatprep.mubr.f32.mxu1 %v1878_v22  ;;  %1575 = vmatpush3.msra.mxu1 %v1947_v7 }
 0x317   :  { %1560 = vmatprep.subr.mxu1 %v1951_v8 }
 0x318   :  { %1576 = vmatpush3.msra.mxu1 %v1951_v8 }
 0x319   :  { %1486 = vmatmul.mubr.f32.gmra.mxu1 %v1885_v23  ;;  %1561 = vmatprep.subr.mxu1 %v1955_v9 }
 0x31a   :  { %1488 = vmatprep.mubr.f32.mxu1 %v1890_v24  ;;  %1577 = vmatpush3.msra.mxu1 %v1955_v9 }
 0x31b   :  { %1562 = vmatprep.subr.mxu1 %v1959_v10 }
 0x31c   :  { %1578 = vmatpush3.msra.mxu1 %v1959_v10 }
 0x31d   :  { %1489 = vmatmul.mubr.f32.gmra.mxu1 %v1897_v25  ;;  %1563 = vmatprep.subr.mxu1 %v1963_v11 }
 0x31e   :  { %1491 = vmatprep.mubr.f32.mxu1 %v1902_v26  ;;  %1579 = vmatpush3.msra.mxu1 %v1963_v11 }
 0x31f   :  { %1564 = vmatprep.subr.mxu1 %v1967_v12 }
 0x320   :  { %1580 = vmatpush3.msra.mxu1 %v1967_v12 }
 0x321   :  { %1492 = vmatmul.mubr.f32.gmra.mxu1 %v1909_v27  ;;  %1565 = vmatprep.subr.mxu1 %v1971_v13 }
 0x322   :  { %1494 = vmatprep.mubr.f32.mxu1 %v1914_v28  ;;  %1581 = vmatpush3.msra.mxu1 %v1971_v13 }
 0x323   :  { %1566 = vmatprep.subr.mxu1 %v762_v15 }
 0x324   :  { %1582 = vmatpush3.msra.mxu1 %v762_v15 }
 0x325   :  { %1495 = vmatmul.mubr.f32.gmra.mxu1 %v1921_v29  ;;  %1567 = vmatprep.subr.mxu1 %v761_v16 }
 0x326   :  { %1583 = vmatpush3.msra.mxu1 %v761_v16 }
 0x327   :  { %1568 = vmatprep.subr.mxu1 %v760_v17 }
 0x328   :  { %1584 = vmatpush3.msra.mxu1 %v760_v17 }
 0x3c9   :  { %v1475_v18 = vpop.f32.mrf.mxu1 }
 0x3ca   :  { %v745_v21 = vmax.f32 %v1475_v18, 0.0 }
 0x3cb   :  { %v665_v19 = vpop.f32.mrf.mxu1 }
 0x3cc   :  { %v744_v20 = vmax.f32 %v665_v19, 0.0 }
 0x3cd   :  { %v1478_v22 = vpop.f32.mrf.mxu1 }
 0x3ce   :  { %1529 = vmatprep.mubr.f32.mxu0 %v744_v20  ;;  %v747_v25 = vmax.f32 %v1478_v22, 0.0 }
 0x3cf   :  { %v675_v23 = vpop.f32.mrf.mxu1  ;;  %1530 = vmatmul.mubr.f32.vlgmr.msra.gmra.mxu0 %v745_v21 }
 0x3d0   :  { %v746_v24 = vmax.f32 %v675_v23, 0.0 }
 0x3d1   :  { %v1481_v26 = vpop.f32.mrf.mxu1 }
 0x3d2   :  { %1532 = vmatprep.mubr.f32.mxu0 %v746_v24  ;;  %v749_v27 = vmax.f32 %v1481_v26, 0.0 }
 0x3d3   :  { %v685_v28 = vpop.f32.mrf.mxu1  ;;  %1533 = vmatmul.mubr.f32.gmra.mxu0 %v747_v25 }
 0x3d4   :  { %v748_v29 = vmax.f32 %v685_v28, 0.0 }
 0x3d5   :  { %v1484_v62 = vpop.f32.mrf.mxu1 }
 0x3d6   :  { %1535 = vmatprep.mubr.f32.mxu0 %v748_v29  ;;  %v751_v63 = vmax.f32 %v1484_v62, 0.0 }
 0x3d7   :  { %v695_v0 = vpop.f32.mrf.mxu1  ;;  %1536 = vmatmul.mubr.f32.gmra.mxu0 %v749_v27 }
 0x3d8   :  { %v750_v1 = vmax.f32 %v695_v0, 0.0 }
 0x3d9   :  { %v1487_v2 = vpop.f32.mrf.mxu1 }
 0x3da   :  { %1538 = vmatprep.mubr.f32.mxu0 %v750_v1  ;;  %v753_v3 = vmax.f32 %v1487_v2, 0.0 }
 0x3db   :  { %v705_v4 = vpop.f32.mrf.mxu1  ;;  %1539 = vmatmul.mubr.f32.gmra.mxu0 %v751_v63 }
 0x3dc   :  { %v752_v5 = vmax.f32 %v705_v4, 0.0 }
 0x3dd   :  { %v1490_v6 = vpop.f32.mrf.mxu1 }
 0x3de   :  { %1541 = vmatprep.mubr.f32.mxu1 %v752_v5  ;;  %v755_v7 = vmax.f32 %v1490_v6, 0.0 }
 0x3df   :  { %v715_v8 = vpop.f32.mrf.mxu1  ;;  %1542 = vmatmul.mubr.f32.vlgmr.msra.gmra.mxu1 %v753_v3 }
 0x3e0   :  { %v754_v9 = vmax.f32 %v715_v8, 0.0 }
 0x3e1   :  { %v1493_v10 = vpop.f32.mrf.mxu1 }
 0x3e2   :  { %1544 = vmatprep.mubr.f32.mxu1 %v754_v9  ;;  %v757_v11 = vmax.f32 %v1493_v10, 0.0 }
 0x3e3   :  { %v725_v12 = vpop.f32.mrf.mxu1  ;;  %1545 = vmatmul.mubr.f32.gmra.mxu1 %v755_v7 }
 0x3e4   :  { %v756_v13 = vmax.f32 %v725_v12, 0.0 }
 0x3e5   :  { %v1496_v14 = vpop.f32.mrf.mxu1 }
 0x3e6   :  { %1547 = vmatprep.mubr.f32.mxu1 %v756_v13  ;;  %v759_v30 = vmax.f32 %v1496_v14, 0.0 }
 0x3e7   :  { %v735_v31 = vpop.f32.mrf.mxu1  ;;  %1548 = vmatmul.mubr.f32.gmra.mxu1 %v757_v11 }
 0x3e8   :  { %v758_v33 = vmax.f32 %v735_v31, 0.0 }
 0x3ea   :  { %1550 = vmatprep.mubr.f32.mxu1 %v758_v33 }
 0x3eb   :  { %1551 = vmatmul.mubr.f32.gmra.mxu1 %v759_v30 }
 0x48f   :  { %v1531_v35 = vpop.f32.mrf.mxu0 }
 0x490   :  { %v855_v36 = vadd.f32 %v1531_v35, %v1112_v34 }
 0x491   :  { %v849_v37 = vpop.f32.mrf.mxu0 }
 0x492   :  { %930 = vmax.xlane.f32.xlu0 %v855_v36  ;;  %v850_v39 = vadd.f32 %v1112_v34, %v849_v37 }
 0x493   :  { %v1534_v38 = vpop.f32.mrf.mxu0 }
 0x494   :  { %v865_v40 = vadd.f32 %v1534_v38, %v1112_v34 }
 0x495   :  { %v859_v41 = vpop.f32.mrf.mxu0 }
 0x496   :  { %928 = vmax.xlane.f32.xlu0 %v850_v39  ;;  %934 = vmax.xlane.f32.xlu1 %v865_v40  ;;  %v860_v42 = vadd.f32 %v1112_v34, %v859_v41 }
 0x497   :  { %v1537_v32 = vpop.f32.mrf.mxu0 }
 0x498   :  { %v875_v46 = vadd.f32 %v1537_v32, %v1112_v34 }
 0x499   :  { %v869_v43 = vpop.f32.mrf.mxu0 }
 0x49a   :  { %v870_v44 = vadd.f32 %v1112_v34, %v869_v43  ;;  %932 = vmax.xlane.f32.xlu1 %v860_v42 }
 0x49b   :  { %v1540_v45 = vpop.f32.mrf.mxu0 }
 0x49c   :  { %936 = vmax.xlane.f32.xlu0 %v870_v44  ;;  %v885_v50 = vadd.f32 %v1540_v45, %v1112_v34 }
 0x49d   :  { %v879_v47 = vpop.f32.mrf.mxu0 }
 0x49e   :  { %v880_v48 = vadd.f32 %v1112_v34, %v879_v47  ;;  %938 = vmax.xlane.f32.xlu1 %v875_v46 }
 0x49f   :  { %v1543_v49 = vpop.f32.mrf.mxu1 }
 0x4a0   :  { %940 = vmax.xlane.f32.xlu0 %v880_v48  ;;  %v895_v54 = vadd.f32 %v1543_v49, %v1112_v34 }
 0x4a1   :  { %v889_v51 = vpop.f32.mrf.mxu1 }
 0x4a2   :  { %v890_v52 = vadd.f32 %v1112_v34, %v889_v51  ;;  %942 = vmax.xlane.f32.xlu1 %v885_v50 }
 0x4a3   :  { %v1546_v53 = vpop.f32.mrf.mxu1 }
 0x4a4   :  { %944 = vmax.xlane.f32.xlu0 %v890_v52  ;;  %v2024_v58 = vadd.f32 %v1546_v53, %v1112_v34 }
 0x4a5   :  { %v899_v55 = vpop.f32.mrf.mxu1 }
 0x4a6   :  { %v900_v56 = vadd.f32 %v1112_v34, %v899_v55  ;;  %946 = vmax.xlane.f32.xlu1 %v895_v54 }
 0x4a7   :  { %v1549_v57 = vpop.f32.mrf.mxu1 }
 0x4a8   :  { %948 = vmax.xlane.f32.xlu0 %v900_v56  ;;  %v2029_v15 = vadd.f32 %v1549_v57, %v1112_v34 }
 0x4a9   :  { %v909_v59 = vpop.f32.mrf.mxu1 }
 0x4aa   :  { %v2026_v60 = vadd.f32 %v1112_v34, %v909_v59  ;;  %950 = vmax.xlane.f32.xlu1 %v2024_v58 }
 0x4ab   :  { %v1552_v61 = vpop.f32.mrf.mxu1 }
 0x4ac   :  { %952 = vmax.xlane.f32.xlu0 %v2026_v60  ;;  %v2035_v18 = vadd.f32 %v1552_v61, %v1112_v34 }
 0x4ad   :  { %v919_v16 = vpop.f32.mrf.mxu1 }
 0x4ae   :  { %v2032_v17 = vadd.f32 %v1112_v34, %v919_v16  ;;  %954 = vmax.xlane.f32.xlu1 %v2029_v15 }
 0x4b0   :  { %956 = vmax.xlane.f32.xlu0 %v2032_v17 }
 0x4b2   :  { %958 = vmax.xlane.f32.xlu1 %v2035_v18 }
 0x51b   :  { %v931_v19 = vpop.xlane.xlu0 %930 }
 0x51c   :  { %v2039_v20 = vsub.f32 %v855_v36, %v931_v19 }
 0x51e   :  { %v978_v21 = vmul.f32 1.442695, %v2039_v20 }
 0x51f   :  { %v929_v22 = vpop.xlane.xlu0 %928  ;;  %v935_v23 = vpop.xlane.xlu1 %934 }
 0x520   :  { %1590 = vpow2.f32 %v978_v21  ;;  %v2042_v24 = vsub.f32 %v850_v39, %v929_v22  ;;  %v2044_v25 = vsub.f32 %v865_v40, %v935_v23 }
 0x522   :  { %v976_v26 = vmul.f32 1.442695, %v2042_v24  ;;  %v982_v27 = vmul.f32 1.442695, %v2044_v25 }
 0x523   :  { %v933_v28 = vpop.xlane.xlu1 %932 }
 0x524   :  { %1592 = vpow2.f32 %v976_v26  ;;  %v2048_v29 = vsub.f32 %v860_v42, %v933_v28 }
 0x525   :  { %1594 = vpow2.f32 %v982_v27  ;;  %v937_v62 = vpop.xlane.xlu0 %936 }
 0x526   :  { %v980_v63 = vmul.f32 1.442695, %v2048_v29  ;;  %v2051_v0 = vsub.f32 %v870_v44, %v937_v62 }
 0x527   :  { %v939_v1 = vpop.xlane.xlu1 %938 }
 0x528   :  { %1596 = vpow2.f32 %v980_v63  ;;  %v984_v2 = vmul.f32 1.442695, %v2051_v0  ;;  %v2054_v3 = vsub.f32 %v875_v46, %v939_v1 }
 0x529   :  { %v941_v4 = vpop.xlane.xlu0 %940 }
 0x52a   :  { %v986_v5 = vmul.f32 1.442695, %v2054_v3  ;;  %v2057_v6 = vsub.f32 %v880_v48, %v941_v4  ;;  %1598 = vpow2.f32 %v984_v2 }
 0x52b   :  { %v943_v7 = vpop.xlane.xlu1 %942 }
 0x52c   :  { %1600 = vpow2.f32 %v986_v5  ;;  %v988_v8 = vmul.f32 1.442695, %v2057_v6  ;;  %v2060_v9 = vsub.f32 %v885_v50, %v943_v7 }
 0x52d   :  { %v1591_v10 = vpop.eup %1590  ;;  %v945_v11 = vpop.xlane.xlu0 %944 }
 0x52e   :  { %v990_v12 = vmul.f32 1.442695, %v2060_v9  ;;  %v2063_v13 = vsub.f32 %v890_v52, %v945_v11  ;;  %1010 = vadd.xlane.f32.xlu1 %v1591_v10  ;;  %1602 = vpow2.f32 %v988_v8 }
 0x52f   :  { %v947_v14 = vpop.xlane.xlu1 %946 }
 0x530   :  { %1604 = vpow2.f32 %v990_v12  ;;  %v992_v30 = vmul.f32 1.442695, %v2063_v13  ;;  %v2066_v31 = vsub.f32 %v895_v54, %v947_v14 }
 0x531   :  { %v1593_v33 = vpop.eup %1592  ;;  %v949_v34 = vpop.xlane.xlu0 %948 }
 0x532   :  { %v1595_v35 = vpop.eup %1594  ;;  %v994_v36 = vmul.f32 1.442695, %v2066_v31  ;;  %v2069_v37 = vsub.f32 %v900_v56, %v949_v34  ;;  %1008 = vadd.xlane.f32.xlu0 %v1593_v33  ;;  %1606 = vpow2.f32 %v992_v30 }
 0x533   :  { %1014 = vadd.xlane.f32.xlu1 %v1595_v35  ;;  %v951_v38 = vpop.xlane.xlu1 %950 }
 0x534   :  { %1608 = vpow2.f32 %v994_v36  ;;  %v996_v39 = vmul.f32 1.442695, %v2069_v37  ;;  %v2073_v40 = vsub.f32 %v2024_v58, %v951_v38 }
 0x535   :  { %v1597_v41 = vpop.eup %1596  ;;  %v953_v32 = vpop.xlane.xlu0 %952 }
 0x536   :  { %v998_v42 = vmul.f32 1.442695, %v2073_v40  ;;  %v2077_v43 = vsub.f32 %v2026_v60, %v953_v32  ;;  %1012 = vadd.xlane.f32.xlu0 %v1597_v41  ;;  %1610 = vpow2.f32 %v996_v39 }
 0x537   :  { %v955_v44 = vpop.xlane.xlu1 %954  ;;  %v1599_v45 = vpop.eup %1598 }
 0x538   :  { %1612 = vpow2.f32 %v998_v42  ;;  %v1000_v46 = vmul.f32 1.442695, %v2077_v43  ;;  %v2081_v47 = vsub.f32 %v2029_v15, %v955_v44 }
 0x539   :  { %v1601_v48 = vpop.eup %1600  ;;  %v957_v49 = vpop.xlane.xlu0 %956 }
 0x53a   :  { %v1002_v50 = vmul.f32 1.442695, %v2081_v47  ;;  %v2085_v51 = vsub.f32 %v2032_v17, %v957_v49  ;;  %1018 = vadd.xlane.f32.xlu1 %v1601_v48  ;;  %1016 = vadd.xlane.f32.xlu0 %v1599_v45  ;;  %1614 = vpow2.f32 %v1000_v46 }
 0x53b   :  { %v959_v52 = vpop.xlane.xlu1 %958  ;;  %v1603_v53 = vpop.eup %1602 }
 0x53c   :  { %1616 = vpow2.f32 %v1002_v50  ;;  %v1004_v54 = vmul.f32 1.442695, %v2085_v51  ;;  %v2089_v55 = vsub.f32 %v2035_v18, %v959_v52 }
 0x53d   :  { %v1605_v56 = vpop.eup %1604 }
 0x53e   :  { %v1006_v57 = vmul.f32 1.442695, %v2089_v55  ;;  %1022 = vadd.xlane.f32.xlu1 %v1605_v56  ;;  %1020 = vadd.xlane.f32.xlu0 %v1603_v53  ;;  %1618 = vpow2.f32 %v1004_v54 }
 0x53f   :  { %v1607_v58 = vpop.eup %1606 }
 0x540   :  { %1620 = vpow2.f32 %v1006_v57 }
 0x541   :  { %v1609_v59 = vpop.eup %1608 }
 0x542   :  { %1026 = vadd.xlane.f32.xlu1 %v1609_v59  ;;  %1024 = vadd.xlane.f32.xlu0 %v1607_v58 }
 0x543   :  { %v1611_v60 = vpop.eup %1610 }
 0x545   :  { %v1613_v61 = vpop.eup %1612 }
 0x546   :  { %1030 = vadd.xlane.f32.xlu1 %v1613_v61  ;;  %1028 = vadd.xlane.f32.xlu0 %v1611_v60 }
 0x547   :  { %v1615_v15 = vpop.eup %1614 }
 0x549   :  { %v1617_v16 = vpop.eup %1616 }
 0x54a   :  { %1034 = vadd.xlane.f32.xlu1 %v1617_v16  ;;  %1032 = vadd.xlane.f32.xlu0 %v1615_v15 }
 0x54b   :  { %v1619_v17 = vpop.eup %1618 }
 0x54d   :  { %v1621_v18 = vpop.eup %1620 }
 0x54e   :  { %1038 = vadd.xlane.f32.xlu1 %v1621_v18  ;;  %1036 = vadd.xlane.f32.xlu0 %v1619_v17 }
 0x5b7   :  { %v1011_v19 = vpop.xlane.xlu1 %1010 }
 0x5b8   :  { %1622 = vlog2.f32 %v1011_v19 }
 0x5bb   :  { %v1009_v21 = vpop.xlane.xlu0 %1008 }
 0x5bc   :  { %v1015_v22 = vpop.xlane.xlu1 %1014  ;;  %1624 = vlog2.f32 %v1009_v21 }
 0x5bd   :  { %1626 = vlog2.f32 %v1015_v22 }
 0x5bf   :  { %v1013_v23 = vpop.xlane.xlu0 %1012 }
 0x5c0   :  { %1628 = vlog2.f32 %v1013_v23 }
 0x5c3   :  { %v1019_v26 = vpop.xlane.xlu1 %1018  ;;  %v1017_v27 = vpop.xlane.xlu0 %1016 }
 0x5c4   :  { %1630 = vlog2.f32 %v1019_v26 }
 0x5c5   :  { %v1623_v28 = vpop.eup %1622  ;;  %1632 = vlog2.f32 %v1017_v27 }
 0x5c6   :  { %v1043_v62 = vmul.f32 0.6931472, %v1623_v28 }
 0x5c7   :  { %v1023_v63 = vpop.xlane.xlu1 %1022  ;;  %v1021_v1 = vpop.xlane.xlu0 %1020 }
 0x5c8   :  { %v1073_v2 = vsub.f32 %v2039_v20, %v1043_v62  ;;  %1634 = vlog2.f32 %v1023_v63 }
 0x5c9   :  { %v1625_v4 = vpop.eup %1624  ;;  %1636 = vlog2.f32 %v1021_v1 }
 0x5ca   :  { %v1627_v5 = vpop.eup %1626  ;;  %1089 = vst [vmem:[%s2164_s8 + $0x8] sm:$0xff] %v1073_v2  ;;  %v1041_v7 = vmul.f32 0.6931472, %v1625_v4 }
 0x5cb   :  { %v1047_v8 = vmul.f32 0.6931472, %v1627_v5  ;;  %v1027_v10 = vpop.xlane.xlu1 %1026  ;;  %v1025_v11 = vpop.xlane.xlu0 %1024 }
 0x5cc   :  { %v1072_v12 = vsub.f32 %v2042_v24, %v1041_v7  ;;  %1638 = vlog2.f32 %v1027_v10 }
 0x5cd   :  { %v1629_v14 = vpop.eup %1628  ;;  %v1075_v30 = vsub.f32 %v2044_v25, %v1047_v8  ;;  %1640 = vlog2.f32 %v1025_v11 }
 0x5ce   :  { %1088 = vst [vmem:[%s2164_s8] sm:$0xff] %v1072_v12  ;;  %v1045_v20 = vmul.f32 0.6931472, %v1629_v14 }
 0x5cf   :  { %1091 = vst [vmem:[%s2164_s8 + $0x18] sm:$0xff] %v1075_v30  ;;  %v1031_v33 = vpop.xlane.xlu1 %1030  ;;  %v1029_v34 = vpop.xlane.xlu0 %1028 }
 0x5d0   :  { %v1074_v35 = vsub.f32 %v2048_v29, %v1045_v20  ;;  %1642 = vlog2.f32 %v1031_v33 }
 0x5d1   :  { %v1631_v24 = vpop.eup %1630  ;;  %1644 = vlog2.f32 %v1029_v34 }
 0x5d2   :  { %v1633_v36 = vpop.eup %1632  ;;  %1090 = vst [vmem:[%s2164_s8 + $0x10] sm:$0xff] %v1074_v35  ;;  %v1051_v25 = vmul.f32 0.6931472, %v1631_v24 }
 0x5d3   :  { %v1049_v38 = vmul.f32 0.6931472, %v1633_v36  ;;  %v1035_v39 = vpop.xlane.xlu1 %1034  ;;  %v1033_v41 = vpop.xlane.xlu0 %1032 }
 0x5d4   :  { %v1077_v32 = vsub.f32 %v2054_v3, %v1051_v25  ;;  %1646 = vlog2.f32 %v1035_v39 }
 0x5d5   :  { %v1635_v42 = vpop.eup %1634  ;;  %v1076_v44 = vsub.f32 %v2051_v0, %v1049_v38  ;;  %1648 = vlog2.f32 %v1033_v41 }
 0x5d6   :  { %v1637_v29 = vpop.eup %1636  ;;  %1093 = vst [vmem:[%s2164_s8 + $0x28] sm:$0xff] %v1077_v32  ;;  %v1055_v45 = vmul.f32 0.6931472, %v1635_v42 }
 0x5d7   :  { %1092 = vst [vmem:[%s2164_s8 + $0x20] sm:$0xff] %v1076_v44  ;;  %v1053_v46 = vmul.f32 0.6931472, %v1637_v29  ;;  %v1039_v48 = vpop.xlane.xlu1 %1038  ;;  %v1037_v49 = vpop.xlane.xlu0 %1036 }
 0x5d8   :  { %v1079_v3 = vsub.f32 %v2060_v9, %v1055_v45  ;;  %1650 = vlog2.f32 %v1039_v48 }
 0x5d9   :  { %v1639_v50 = vpop.eup %1638  ;;  %v1078_v0 = vsub.f32 %v2057_v6, %v1053_v46  ;;  %1652 = vlog2.f32 %v1037_v49 }
 0x5da   :  { %v1641_v52 = vpop.eup %1640  ;;  %1095 = vst [vmem:[%s2164_s8 + $0x38] sm:$0xff] %v1079_v3  ;;  %v1059_v53 = vmul.f32 0.6931472, %v1639_v50 }
 0x5db   :  { %1094 = vst [vmem:[%s2164_s8 + $0x30] sm:$0xff] %v1078_v0  ;;  %v1057_v54 = vmul.f32 0.6931472, %v1641_v52 }
 0x5dc   :  { %v1081_v56 = vsub.f32 %v2066_v31, %v1059_v53 }
 0x5dd   :  { %v1643_v57 = vpop.eup %1642  ;;  %v1080_v9 = vsub.f32 %v2063_v13, %v1057_v54 }
 0x5de   :  { %v1645_v58 = vpop.eup %1644  ;;  %1097 = vst [vmem:[%s2164_s8 + $0x48] sm:$0xff] %v1081_v56  ;;  %v1063_v6 = vmul.f32 0.6931472, %v1643_v57 }
 0x5df   :  { %1096 = vst [vmem:[%s2164_s8 + $0x40] sm:$0xff] %v1080_v9  ;;  %v1061_v59 = vmul.f32 0.6931472, %v1645_v58 }
 0x5e0   :  { %v1083_v60 = vsub.f32 %v2073_v40, %v1063_v6 }
 0x5e1   :  { %v1647_v61 = vpop.eup %1646  ;;  %v1082_v15 = vsub.f32 %v2069_v37, %v1061_v59 }
 0x5e2   :  { %v1649_v31 = vpop.eup %1648  ;;  %1099 = vst [vmem:[%s2164_s8 + $0x58] sm:$0xff] %v1083_v60  ;;  %v1067_v13 = vmul.f32 0.6931472, %v1647_v61 }
 0x5e3   :  { %1098 = vst [vmem:[%s2164_s8 + $0x50] sm:$0xff] %v1082_v15  ;;  %v1065_v16 = vmul.f32 0.6931472, %v1649_v31 }
 0x5e4   :  { %v1085_v17 = vsub.f32 %v2081_v47, %v1067_v13 }
 0x5e5   :  { %v1651_v18 = vpop.eup %1650  ;;  %v1084_v19 = vsub.f32 %v2077_v43, %v1065_v16 }
 0x5e6   :  { %v1653_v40 = vpop.eup %1652  ;;  %1101 = vst [vmem:[%s2164_s8 + $0x68] sm:$0xff] %v1085_v17  ;;  %v1071_v37 = vmul.f32 0.6931472, %v1651_v18 }
 0x5e7   :  { %1100 = vst [vmem:[%s2164_s8 + $0x60] sm:$0xff] %v1084_v19  ;;  %v1069_v21 = vmul.f32 0.6931472, %v1653_v40 }
 0x5e8   :  { %v1087_v22 = vsub.f32 %v2089_v55, %v1071_v37 }
 0x5e9   :  { %v1086_v23 = vsub.f32 %v2085_v51, %v1069_v21 }
 0x5ea   :  { %1103 = vst [vmem:[%s2164_s8 + $0x78] sm:$0xff] %v1087_v22 }
 0x5eb   :  { %1102 = vst [vmem:[%s2164_s8 + $0x70] sm:$0xff] %v1086_v23 }
 0x5ec   :  { %1108 = vsyncpa [#allocation3], 1 }
 0x5ed   :  { %1109 = vsyncpa [#allocation5], 1 }

</bundles_post_ra>
